<compile_context>
chip_gen: v6e
topology: v6e:2x2x1
jax: 0.10.0
libtpu: 0.0.40
codegen_flags: <defaults>
</compile_context>

<pallas_src>
import jax
import jax.numpy as jnp
from jax.experimental import pallas as pl
from jax.experimental.pallas import tpu as pltpu


def _round_up(n, m):
    return ((n + m - 1) // m) * m


# ----------------------------- kernels ------------------------------------ #

def concat_fusion_kernel(x_ref, y_ref, wx_ref, wy_ref, b_ref, o_ref):
    """mode==0: fc_out(cat(x, y)) == x@Wx + y@Wy + b."""
    acc = jnp.dot(x_ref[...], wx_ref[...], preferred_element_type=jnp.float32)
    acc = acc + jnp.dot(y_ref[...], wy_ref[...], preferred_element_type=jnp.float32)
    o_ref[...] = (acc + b_ref[...].astype(jnp.float32)).astype(o_ref.dtype)


def split_fusion_kernel(x_ref, y_ref, wx_ref, wy_ref, b_ref, xo_ref, yo_ref):
    """mode!=0: fc_out(cat(x, 0)) and fc_out(cat(0, y)) in a single kernel."""
    b = b_ref[...].astype(jnp.float32)
    xo = jnp.dot(x_ref[...], wx_ref[...], preferred_element_type=jnp.float32) + b
    yo = jnp.dot(y_ref[...], wy_ref[...], preferred_element_type=jnp.float32) + b
    xo_ref[...] = xo.astype(xo_ref.dtype)
    yo_ref[...] = yo.astype(yo_ref.dtype)


# ----------------------------- wrapper ------------------------------------- #

def concat_fusion_forward(x, y, w, b, mode=0):
    """x: [B, Dx], y: [B, Dy], w: [O, Dx+Dy] (PyTorch layout), b: [O]."""
    B, Dx = x.shape
    By, Dy = y.shape
    assert B == By
    O, Dt = w.shape
    assert Dt == Dx + Dy

    # Split & transpose the weight so each modality gets a [D, O] matmul operand;
    # pad the output feature dim to a lane-dense multiple of 128 (zero columns -> zero
    # outputs + zero bias, sliced away at the end).
    O_pad = _round_up(O, 128)
    wT = jnp.transpose(w)                          # [Dt, O]
    wx, wy = wT[:Dx], wT[Dx:]
    if O_pad != O:
        wx = jnp.pad(wx, ((0, 0), (0, O_pad - O)))
        wy = jnp.pad(wy, ((0, 0), (0, O_pad - O)))
        b_pad = jnp.pad(b, (0, O_pad - O))
    else:
        b_pad = b
    b2 = b_pad.reshape(1, O_pad)

    # Batch tiling: 8-row granularity for tiny batches, 256-row tiles otherwise.
    TB = 256 if B >= 256 else _round_up(max(B, 8), 8)
    B_pad = _round_up(B, TB)
    if B_pad != B:
        x = jnp.pad(x, ((0, B_pad - B), (0, 0)))
        y = jnp.pad(y, ((0, B_pad - B), (0, 0)))
    grid = (B_pad // TB,)

    x_spec = pl.BlockSpec((TB, Dx), lambda i: (i, 0))
    y_spec = pl.BlockSpec((TB, Dy), lambda i: (i, 0))
    wx_spec = pl.BlockSpec((Dx, O_pad), lambda i: (0, 0))
    wy_spec = pl.BlockSpec((Dy, O_pad), lambda i: (0, 0))
    b_spec = pl.BlockSpec((1, O_pad), lambda i: (0, 0))
    o_spec = pl.BlockSpec((TB, O_pad), lambda i: (i, 0))

    itemsize = jnp.dtype(x.dtype).itemsize
    in_bytes = (x.size + y.size + wx.size + wy.size + b2.size) * itemsize
    compiler_params = pltpu.CompilerParams(
        dimension_semantics=("parallel",),
        vmem_limit_bytes=32 * 1024 * 1024,   # safe on v5e/v6e and v7x's 64 MiB VMEM
    )

    if mode == 0:
        cost = pl.CostEstimate(
            flops=2 * B_pad * Dt * O_pad,
            transcendentals=0,
            bytes_accessed=in_bytes + B_pad * O_pad * itemsize,
        )
        out = pl.pallas_call(
            concat_fusion_kernel,
            out_shape=jax.ShapeDtypeStruct((B_pad, O_pad), x.dtype),
            grid=grid,
            in_specs=[x_spec, y_spec, wx_spec, wy_spec, b_spec],
            out_specs=o_spec,
            compiler_params=compiler_params,
            cost_estimate=cost,
        )(x, y, wx, wy, b2)
        return out[:B, :O]
    else:
        cost = pl.CostEstimate(
            flops=2 * B_pad * Dt * O_pad,
            transcendentals=0,
            bytes_accessed=in_bytes + 2 * B_pad * O_pad * itemsize,
        )
        xo, yo = pl.pallas_call(
            split_fusion_kernel,
            out_shape=(jax.ShapeDtypeStruct((B_pad, O_pad), x.dtype),
                       jax.ShapeDtypeStruct((B_pad, O_pad), y.dtype)),
            grid=grid,
            in_specs=[x_spec, y_spec, wx_spec, wy_spec, b_spec],
            out_specs=(o_spec, o_spec),
            compiler_params=compiler_params,
            cost_estimate=cost,
        )(x, y, wx, wy, b2)
        return xo[:B, :O], yo[:B, :O]


# ----------------------------- reference ----------------------------------- #

def concat_fusion_reference(x, y, w, b, mode=0):
    if mode == 0:
        feature = jnp.concatenate([x, y], axis=1)
        return feature @ w.T + b
    fx = jnp.concatenate([x, jnp.zeros_like(y)], axis=1)
    fy = jnp.concatenate([jnp.zeros_like(x), y], axis=1)
    return fx @ w.T + b, fy @ w.T + b


# ------------------------------- main --------------------------------------- #

if __name__ == "__main__":
    # Small ConcatFusion: each modality feature 128-dim (input_dim=256), output_dim=100
    # (exercises the pad-to-128 lane-dense output path), batch=8.
    B, Dx, Dy, O = 8, 128, 128, 100
    Dt = Dx + Dy

    key = jax.random.PRNGKey(0)
    kx, ky, kw, kb = jax.random.split(key, 4)
    x = jax.random.normal(kx, (B, Dx), dtype=jnp.float32)
    y = jax.random.normal(ky, (B, Dy), dtype=jnp.float32)

    # PyTorch-Linear-like uniform init, weight stored in PyTorch layout [O, Dt].
    bound = 1.0 / (Dt ** 0.5)
    w = jax.random.uniform(kw, (O, Dt), minval=-bound, maxval=bound, dtype=jnp.float32)
    b = jax.random.uniform(kb, (O,), minval=-bound, maxval=bound, dtype=jnp.float32)

    # mode == 0 (single fused projection of the concatenated features)
    out = jax.block_until_ready(concat_fusion_forward(x, y, w, b, mode=0))
    ref = concat_fusion_reference(x, y, w, b, mode=0)
    assert out.shape == ref.shape
    assert jnp.allclose(out, ref, atol=2e-4, rtol=2e-4), "mode=0 mismatch"

    # mode == 1 (per-modality projections, zero-padded other half) — one kernel launch
    xo, yo = concat_fusion_forward(x, y, w, b, mode=1)
    xo = jax.block_until_ready(xo)
    yo = jax.block_until_ready(yo)
    xr, yr = concat_fusion_reference(x, y, w, b, mode=1)
    assert jnp.allclose(xo, xr, atol=2e-4, rtol=2e-4), "mode=1 x mismatch"
    assert jnp.allclose(yo, yr, atol=2e-4, rtol=2e-4), "mode=1 y mismatch"

    print("KERNEL_OK")
</pallas_src>

<mosaic_0001>
module attributes {stable_mosaic.version = 11 : i64} {
  func.func @concat_fusion_kernel(%arg0: i32, %arg1: memref<8x128xf32, #tpu.memory_space<vmem>>, %arg2: memref<8x128xf32, #tpu.memory_space<vmem>>, %arg3: memref<128x128xf32, #tpu.memory_space<vmem>>, %arg4: memref<128x128xf32, #tpu.memory_space<vmem>>, %arg5: memref<1x128xf32, #tpu.memory_space<vmem>>, %arg6: memref<8x128xf32, #tpu.memory_space<vmem>>) attributes {dimension_semantics = [#tpu.dimension_semantics<parallel>], iteration_bounds = array<i64: 1>, scalar_prefetch = 0 : i64, scratch_operands = 0 : i64, tpu.core_type = #tpu.core_type<tc>, window_params = [{transform_indices = @transform_0, window_bounds = array<i64: 8, 128>}, {transform_indices = @transform_1, window_bounds = array<i64: 8, 128>}, {pipeline_mode = #tpu.pipeline_mode<synchronous>, transform_indices = @transform_2, window_bounds = array<i64: 128, 128>}, {pipeline_mode = #tpu.pipeline_mode<synchronous>, transform_indices = @transform_3, window_bounds = array<i64: 128, 128>}, {pipeline_mode = #tpu.pipeline_mode<synchronous>, transform_indices = @transform_4, window_bounds = array<i64: 1, 128>}, {transform_indices = @transform_5, window_bounds = array<i64: 8, 128>}]} {
    %c0 = arith.constant 0 : index
    %c0_0 = arith.constant 0 : index
    %0 = vector.load %arg1[%c0, %c0_0] : memref<8x128xf32, #tpu.memory_space<vmem>>, vector<8x128xf32>
    %c0_1 = arith.constant 0 : index
    %c0_2 = arith.constant 0 : index
    %1 = vector.load %arg3[%c0_1, %c0_2] : memref<128x128xf32, #tpu.memory_space<vmem>>, vector<128x128xf32>
    %cst = arith.constant dense<0.000000e+00> : vector<8x128xf32>
    %2 = tpu.matmul %0, %1, %cst {dimension_numbers = #tpu.dot_dimension_numbers<[1], [0], [0], [1], [0, 0, 1, 1], [], []>} : vector<8x128xf32>, vector<128x128xf32>, vector<8x128xf32> -> vector<8x128xf32>
    %c0_3 = arith.constant 0 : index
    %c0_4 = arith.constant 0 : index
    %3 = vector.load %arg2[%c0_3, %c0_4] : memref<8x128xf32, #tpu.memory_space<vmem>>, vector<8x128xf32>
    %c0_5 = arith.constant 0 : index
    %c0_6 = arith.constant 0 : index
    %4 = vector.load %arg4[%c0_5, %c0_6] : memref<128x128xf32, #tpu.memory_space<vmem>>, vector<128x128xf32>
    %cst_7 = arith.constant dense<0.000000e+00> : vector<8x128xf32>
    %5 = tpu.matmul %3, %4, %cst_7 {dimension_numbers = #tpu.dot_dimension_numbers<[1], [0], [0], [1], [0, 0, 1, 1], [], []>} : vector<8x128xf32>, vector<128x128xf32>, vector<8x128xf32> -> vector<8x128xf32>
    %6 = arith.addf %2, %5 : vector<8x128xf32>
    %c0_8 = arith.constant 0 : index
    %c0_9 = arith.constant 0 : index
    %7 = vector.load %arg5[%c0_8, %c0_9] : memref<1x128xf32, #tpu.memory_space<vmem>>, vector<1x128xf32>
    %8 = vector.broadcast %7 : vector<1x128xf32> to vector<8x128xf32>
    %9 = arith.addf %6, %8 : vector<8x128xf32>
    %c0_10 = arith.constant 0 : index
    %c0_11 = arith.constant 0 : index
    %10 = vector.load %arg6[%c0_10, %c0_11] : memref<8x128xf32, #tpu.memory_space<vmem>>, vector<8x128xf32>
    tpu.vector_store %arg6[%c0_10, %c0_11], %9 {strides = array<i32>} : memref<8x128xf32, #tpu.memory_space<vmem>>, vector<8x128xf32>,
    return
  }
  func.func @transform_0(%arg0: i32) -> (i32, i32) {
    %c0_i32 = arith.constant 0 : i32
    %c0_i32_0 = arith.constant 0 : i32
    return %arg0, %c0_i32 : i32, i32
  }
  func.func @transform_1(%arg0: i32) -> (i32, i32) {
    %c0_i32 = arith.constant 0 : i32
    %c0_i32_0 = arith.constant 0 : i32
    return %arg0, %c0_i32 : i32, i32
  }
  func.func @transform_2(%arg0: i32) -> (i32, i32) {
    %c0_i32 = arith.constant 0 : i32
    %c0_i32_0 = arith.constant 0 : i32
    %c0_i32_1 = arith.constant 0 : i32
    return %c0_i32, %c0_i32_0 : i32, i32
  }
  func.func @transform_3(%arg0: i32) -> (i32, i32) {
    %c0_i32 = arith.constant 0 : i32
    %c0_i32_0 = arith.constant 0 : i32
    %c0_i32_1 = arith.constant 0 : i32
    return %c0_i32, %c0_i32_0 : i32, i32
  }
  func.func @transform_4(%arg0: i32) -> (i32, i32) {
    %c0_i32 = arith.constant 0 : i32
    %c0_i32_0 = arith.constant 0 : i32
    %c0_i32_1 = arith.constant 0 : i32
    return %c0_i32, %c0_i32_0 : i32, i32
  }
  func.func @transform_5(%arg0: i32) -> (i32, i32) {
    %c0_i32 = arith.constant 0 : i32
    %c0_i32_0 = arith.constant 0 : i32
    return %arg0, %c0_i32 : i32, i32
  }
}

</mosaic_0001>

<bundles_post_ra>
// kernel: tpu_custom_call.1
= control target key start
LH: loop header
LB: loop body
LE: loop exit
PB: predicated region body
PF: predicated region fallthrough
CT: control target
= control target key end

     0   :  { %10 = vsyncpa [#allocation3], 0  ;;  %s585_s0 = inlined_call_operand.hbm [shape: f32[8,128], index: 0, kind: input, shape index: {}]   ;;  %s586_s1 = inlined_call_operand.hbm [shape: f32[8,128], index: 1, kind: input, shape index: {}]   ;;  %s587_s2 = inlined_call_operand.hbm [shape: f32[128,128], index: 2, kind: input, shape index: {}]   ;;  %s588_s3 = inlined_call_operand.hbm [shape: f32[128,128], index: 3, kind: input, shape index: {}]   ;;  %s589_s4 = inlined_call_operand.vmem [shape: f32[1,128], index: 4, kind: input, shape index: {}]   ;;  %s590_s5 = inlined_call_operand.hbm [shape: f32[8,128], index: 5, kind: output, shape index: {}]  }
   0x1   :  { %11 = vsyncpa [#allocation6], 0 }
   0x2   :  { %12 = vsyncpa [#allocation9], 0 }
   0x3   :  { %13 = vsyncpa [#allocation4], 0  ;;  %s494_s18 = smov [#allocation5]   ;;  %s495_s20 = smov [#allocation2]  }
   0x4   :  { %s30_s19 = sshll.u32 %s494_s18, 4  ;;  %s20_s21 = sshll.u32 %s495_s20, 4  ;;  %s31_s19 = int_to_ptr.vmem [resolvable:$true] %s30_s19  ;;  %s21_s21 = int_to_ptr.vmem [resolvable:$true] %s20_s21 }
   0x5   :  { %s394_s22 = scalar_lea.vmem %s31_s19, 128  ;;  %p399_p1 = scmp.lt.s32.totalorder %s31_s19, %s31_s19 }
   0x6   :  { %p395_p0 = scmp.ne.s32.totalorder %s31_s19, %s394_s22  ;;  %p400_p2 = scmp.lt.s32.totalorder %s394_s22, %s394_s22 }
   0x8   :  { %p401_p3 = por %p400_p2, %p399_p1 }
   0xa   :  { %p402_p4 = pnand %p401_p3, %p395_p0 }
   0xc   :  { %405 = shalt.err (!%p402_p4)
}
   0xd   :  { %33 = dma.hbm_to_vmem [thread:$0]  %s586_s1, 128, %s31_s19, [#allocation6]  }
   0xe   :  { %s414_s25 = scalar_lea.vmem %s21_s21, 128  ;;  %p419_p6 = scmp.lt.s32.totalorder %s21_s21, %s21_s21 }
   0xf   :  { %p415_p5 = scmp.ne.s32.totalorder %s21_s21, %s414_s25  ;;  %p420_p7 = scmp.lt.s32.totalorder %s414_s25, %s414_s25 }
  0x11   :  { %p421_p8 = por %p420_p7, %p419_p6 }
  0x13   :  { %p422_p9 = pnand %p421_p8, %p415_p5 }
  0x15   :  { %425 = shalt.err (!%p422_p9)
}
  0x16   :  { %23 = dma.hbm_to_vmem [thread:$0]  %s585_s0, 128, %s21_s21, [#allocation3]  }
  0x17   :  { %s496_s28 = smov [#allocation7]  }
  0x18   :  { %s39_s29 = sshll.u32 %s496_s28, 4  ;;  %s40_s29 = int_to_ptr.vmem [resolvable:$true] %s39_s29 }
  0x19   :  { %s434_s30 = scalar_lea.vmem %s40_s29, 2048  ;;  %p439_p11 = scmp.lt.s32.totalorder %s40_s29, %s40_s29 }
  0x1a   :  { %p435_p10 = scmp.ne.s32.totalorder %s40_s29, %s434_s30  ;;  %p440_p12 = scmp.lt.s32.totalorder %s434_s30, %s434_s30 }
  0x1c   :  { %p441_p13 = por %p440_p12, %p439_p11 }
  0x1e   :  { %p442_p0 = pnand %p441_p13, %p435_p10 }
  0x20   :  { %445 = shalt.err (!%p442_p0)
}
  0x21   :  { %s497_s1 = smov 128   ;;  %s498_s6 = smov 8  }
  0x22   :  { %45 = dma.hbm_to_vmem [thread:$0]  %s587_s2, 2048, %s40_s29, [#allocation6], %s497_s1, %s497_s1, %s498_s6  }
  0x23   :  { %s499_s9 = smov [#allocation8]  }
  0x24   :  { %s51_s10 = sshll.u32 %s499_s9, 4  ;;  %s52_s10 = int_to_ptr.vmem [resolvable:$true] %s51_s10 }
  0x25   :  { %s454_s0 = scalar_lea.vmem %s52_s10, 2048  ;;  %p459_p2 = scmp.lt.s32.totalorder %s52_s10, %s52_s10 }
  0x26   :  { %p455_p1 = scmp.ne.s32.totalorder %s52_s10, %s454_s0  ;;  %p460_p3 = scmp.lt.s32.totalorder %s454_s0, %s454_s0 }
  0x28   :  { %p461_p4 = por %p460_p3, %p459_p2 }
  0x2a   :  { %p462_p5 = pnand %p461_p4, %p455_p1 }
  0x2c   :  { %465 = shalt.err (!%p462_p5)
}
  0x2d   :  { %57 = dma.hbm_to_vmem [thread:$0]  %s588_s3, 2048, %s52_s10, [#allocation9], %s497_s1, %s497_s1, %s498_s6  }
  0x2e   :  { %486 = dma.done.wait [#allocation3], 128  }
  0x2f   :  { %487 = vsyncadd [#allocation3], 4294967168 }
  0x30   :  { %488 = dma.done.wait [#allocation6], 2176  }
  0x31   :  { %489 = vsyncadd [#allocation6], 4294965120 }
  0x32   :  { %490 = dma.done.wait [#allocation9], 2048  }
  0x33   :  { %491 = vsyncadd [#allocation9], 4294965248  ;;  %v500_v0 = vmov 0.0   ;;  %vm501_vm0 = vmmov 0   ;;  %v105_v1 = vld [vmem:[#allocation8 + $0x78] sm:$0xff]  ;;  %v104_v3 = vld [vmem:[#allocation8 + $0x70] sm:$0xff] }
  0x34   :  { %307 = vmatprep.subr.mxu0 %v500_v0  ;;  %342 = vmatprep.subr.mxu1 %v500_v0  ;;  %v88_v2 = vld [vmem:[#allocation7 + $0x78] sm:$0xff]  ;;  %v87_v4 = vld [vmem:[#allocation7 + $0x70] sm:$0xff]  ;;  %v103_v5 = vld [vmem:[#allocation8 + $0x68] sm:$0xff]  ;;  %s502_s13 = smov [#allocation10]  }
  0x35   :  { %339 = vmatprep.mubr.msk.f32.mxu0 %vm501_vm0, %v500_v0  ;;  %374 = vmatprep.mubr.msk.f32.mxu1 %vm501_vm0, %v500_v0  ;;  %v86_v6 = vld [vmem:[#allocation7 + $0x68] sm:$0xff]  ;;  %v102_v7 = vld [vmem:[#allocation8 + $0x60] sm:$0xff]  ;;  %v101_v9 = vld [vmem:[#allocation8 + $0x58] sm:$0xff]  ;;  %s261_s14 = sshll.u32 %s502_s13, 4  ;;  %s262_s14 = int_to_ptr.vmem [resolvable:$true] %s261_s14 }
  0x36   :  { %308 = vmatpush3.msra.mxu0 %v105_v1  ;;  %343 = vmatpush3.msra.mxu1 %v88_v2  ;;  %v85_v8 = vld [vmem:[#allocation7 + $0x60] sm:$0xff]  ;;  %v84_v10 = vld [vmem:[#allocation7 + $0x58] sm:$0xff]  ;;  %v100_v11 = vld [vmem:[#allocation8 + $0x50] sm:$0xff]  ;;  %s466_s15 = scalar_lea.vmem %s262_s14, 128  ;;  %p471_p7 = scmp.lt.s32.totalorder %s262_s14, %s262_s14 }
  0x37   :  { %309 = vmatprep.subr.mxu0 %v500_v0  ;;  %344 = vmatprep.subr.mxu1 %v500_v0  ;;  %v83_v12 = vld [vmem:[#allocation7 + $0x50] sm:$0xff]  ;;  %v99_v13 = vld [vmem:[#allocation8 + $0x48] sm:$0xff]  ;;  %v98_v15 = vld [vmem:[#allocation8 + $0x40] sm:$0xff]  ;;  %p467_p6 = scmp.ne.s32.totalorder %s262_s14, %s466_s15  ;;  %p472_p8 = scmp.lt.s32.totalorder %s466_s15, %s466_s15 }
  0x38   :  { %310 = vmatpush3.msra.mxu0 %v104_v3  ;;  %345 = vmatpush3.msra.mxu1 %v87_v4  ;;  %v82_v14 = vld [vmem:[#allocation7 + $0x48] sm:$0xff]  ;;  %v81_v16 = vld [vmem:[#allocation7 + $0x40] sm:$0xff]  ;;  %v97_v17 = vld [vmem:[#allocation8 + $0x38] sm:$0xff] }
  0x39   :  { %311 = vmatprep.subr.mxu0 %v500_v0  ;;  %346 = vmatprep.subr.mxu1 %v500_v0  ;;  %v80_v18 = vld [vmem:[#allocation7 + $0x38] sm:$0xff]  ;;  %v96_v19 = vld [vmem:[#allocation8 + $0x30] sm:$0xff]  ;;  %v95_v21 = vld [vmem:[#allocation8 + $0x28] sm:$0xff]  ;;  %p473_p9 = por %p472_p8, %p471_p7 }
  0x3a   :  { %312 = vmatpush3.msra.mxu0 %v103_v5  ;;  %347 = vmatpush3.msra.mxu1 %v86_v6  ;;  %v79_v20 = vld [vmem:[#allocation7 + $0x30] sm:$0xff]  ;;  %v78_v22 = vld [vmem:[#allocation7 + $0x28] sm:$0xff]  ;;  %v94_v23 = vld [vmem:[#allocation8 + $0x20] sm:$0xff] }
  0x3b   :  { %313 = vmatprep.subr.mxu0 %v500_v0  ;;  %348 = vmatprep.subr.mxu1 %v500_v0  ;;  %v77_v24 = vld [vmem:[#allocation7 + $0x20] sm:$0xff]  ;;  %v93_v25 = vld [vmem:[#allocation8 + $0x18] sm:$0xff]  ;;  %v92_v27 = vld [vmem:[#allocation8 + $0x10] sm:$0xff]  ;;  %p474_p10 = pnand %p473_p9, %p467_p6 }
  0x3c   :  { %314 = vmatpush3.msra.mxu0 %v102_v7  ;;  %349 = vmatpush3.msra.mxu1 %v85_v8  ;;  %v76_v26 = vld [vmem:[#allocation7 + $0x18] sm:$0xff]  ;;  %v75_v28 = vld [vmem:[#allocation7 + $0x10] sm:$0xff]  ;;  %v91_v29 = vld [vmem:[#allocation8 + $0x8] sm:$0xff] }
  0x3d   :  { %315 = vmatprep.subr.mxu0 %v500_v0  ;;  %350 = vmatprep.subr.mxu1 %v500_v0  ;;  %v74_v30 = vld [vmem:[#allocation7 + $0x8] sm:$0xff]  ;;  %v90_v31 = vld [vmem:[#allocation8] sm:$0xff]  ;;  %v89_v33 = vld [vmem:[#allocation5] sm:$0xff] }
  0x3e   :  { %316 = vmatpush3.msra.mxu0 %v101_v9  ;;  %351 = vmatpush3.msra.mxu1 %v84_v10  ;;  %v73_v32 = vld [vmem:[#allocation7] sm:$0xff]  ;;  %v72_v34 = vld [vmem:[#allocation2] sm:$0xff] }
  0x3f   :  { %317 = vmatprep.subr.mxu0 %v500_v0  ;;  %352 = vmatprep.subr.mxu1 %v500_v0  ;;  %v272_v37 = vld [vmem:[%s589_s4] ss:$0 sm:$0xff] }
  0x40   :  { %318 = vmatpush3.msra.mxu0 %v100_v11  ;;  %353 = vmatpush3.msra.mxu1 %v83_v12 }
  0x41   :  { %319 = vmatprep.subr.mxu0 %v500_v0  ;;  %354 = vmatprep.subr.mxu1 %v500_v0 }
  0x42   :  { %320 = vmatpush3.msra.mxu0 %v99_v13  ;;  %355 = vmatpush3.msra.mxu1 %v82_v14 }
  0x43   :  { %321 = vmatprep.subr.mxu0 %v500_v0  ;;  %356 = vmatprep.subr.mxu1 %v500_v0 }
  0x44   :  { %322 = vmatpush3.msra.mxu0 %v98_v15  ;;  %357 = vmatpush3.msra.mxu1 %v81_v16 }
  0x45   :  { %323 = vmatprep.subr.mxu0 %v500_v0  ;;  %358 = vmatprep.subr.mxu1 %v500_v0 }
  0x46   :  { %324 = vmatpush3.msra.mxu0 %v97_v17  ;;  %359 = vmatpush3.msra.mxu1 %v80_v18 }
  0x47   :  { %325 = vmatprep.subr.mxu0 %v500_v0  ;;  %360 = vmatprep.subr.mxu1 %v500_v0 }
  0x48   :  { %326 = vmatpush3.msra.mxu0 %v96_v19  ;;  %361 = vmatpush3.msra.mxu1 %v79_v20 }
  0x49   :  { %327 = vmatprep.subr.mxu0 %v500_v0  ;;  %362 = vmatprep.subr.mxu1 %v500_v0 }
  0x4a   :  { %328 = vmatpush3.msra.mxu0 %v95_v21  ;;  %363 = vmatpush3.msra.mxu1 %v78_v22 }
  0x4b   :  { %329 = vmatprep.subr.mxu0 %v500_v0  ;;  %364 = vmatprep.subr.mxu1 %v500_v0 }
  0x4c   :  { %330 = vmatpush3.msra.mxu0 %v94_v23  ;;  %365 = vmatpush3.msra.mxu1 %v77_v24 }
  0x4d   :  { %331 = vmatprep.subr.mxu0 %v500_v0  ;;  %366 = vmatprep.subr.mxu1 %v500_v0 }
  0x4e   :  { %332 = vmatpush3.msra.mxu0 %v93_v25  ;;  %367 = vmatpush3.msra.mxu1 %v76_v26 }
  0x4f   :  { %333 = vmatprep.subr.mxu0 %v500_v0  ;;  %368 = vmatprep.subr.mxu1 %v500_v0 }
  0x50   :  { %334 = vmatpush3.msra.mxu0 %v92_v27  ;;  %369 = vmatpush3.msra.mxu1 %v75_v28 }
  0x51   :  { %335 = vmatprep.subr.mxu0 %v500_v0  ;;  %370 = vmatprep.subr.mxu1 %v500_v0 }
  0x52   :  { %336 = vmatpush3.msra.mxu0 %v91_v29  ;;  %371 = vmatpush3.msra.mxu1 %v74_v30 }
  0x53   :  { %337 = vmatprep.subr.mxu0 %v500_v0  ;;  %372 = vmatprep.subr.mxu1 %v500_v0 }
  0x54   :  { %338 = vmatpush3.msra.mxu0 %v90_v31  ;;  %373 = vmatpush3.msra.mxu1 %v73_v32 }
  0x55   :  { %340 = vmatmul.mubr.f32.vlgmr.msra.gmra.mxu0 %v89_v33  ;;  %375 = vmatmul.mubr.f32.vlgmr.msra.gmra.mxu1 %v72_v34 }
 0x115   :  { %v172_v35 = vpop.f32.mrf.mxu0  ;;  %v242_v36 = vpop.f32.mrf.mxu1 }
 0x116   :  { %v243_v38 = vadd.f32 %v242_v36, %v172_v35 }
 0x117   :  { %v341_v39 = vpop.f32.mrf.mxu0  ;;  %v376_v40 = vpop.f32.mrf.mxu1 }
 0x118   :  { %v253_v41 = vadd.f32 %v272_v37, %v243_v38 }
 0x11a   :  { %254 = vst [vmem:[#allocation10] sm:$0xff] %v253_v41 }
 0x11b   :  { %477 = shalt.err (!%p474_p10)
}
 0x11c   :  { %264 = dma.vmem_to_hbm [thread:$0]  %s262_s14, 128, %s590_s5, [#allocation4]  }
 0x11d   :  { %492 = dma.done.wait [#allocation4], 128  }
 0x11e   :  { %493 = vsyncadd [#allocation4], 4294967168 }
 0x11f   :  { %268 = vsyncpa [#allocation3], 1 }
 0x120   :  { %269 = vsyncpa [#allocation6], 1 }
 0x121   :  { %270 = vsyncpa [#allocation9], 1 }
 0x122   :  { %271 = vsyncpa [#allocation4], 1 }

</bundles_post_ra>
